<compile_context>
chip_gen: v6e
topology: v6e:2x2x1
jax: 0.10.0
libtpu: 0.0.40
codegen_flags: <defaults>
</compile_context>

<pallas_src>
import jax
import jax.numpy as jnp
from jax.experimental import pallas as pl
from jax.experimental.pallas import tpu as pltpu


def _round_up(x, m):
    return (x + m - 1) // m * m


# ---------------------------------------------------------------------------
# Kernel: y = x_bf16 @ w_eff_bf16 + b_eff  (normalization folded into w/b)
# ---------------------------------------------------------------------------
def _linear_kernel(x_ref, w_ref, b_ref, o_ref):
    x_bf = x_ref[...].astype(jnp.bfloat16)
    o_ref[...] = (
        jnp.dot(x_bf, w_ref[...], preferred_element_type=jnp.float32) + b_ref[...]
    )


# ---------------------------------------------------------------------------
# One-time parameter preparation (hoisted out of the forward path).
# ---------------------------------------------------------------------------
def fold_overfitting_params(mu, sigma, w, b, H, W):
    """Fold (x - mu)/sigma into the linear head.  Returns (w_pad, b_pad, K).

    mu, sigma: (C,) f32; w: (D, K) f32 with D = C*H*W; b: (1, K) f32.
    w_pad: (D, K_pad) bf16; b_pad: (1, K_pad) f32, K_pad = round_up(K, 128).
    """
    C = mu.shape[0]
    D, K = w.shape
    hw = H * W
    assert D == C * hw

    mu32 = mu.astype(jnp.float32)
    inv_sigma = 1.0 / sigma.astype(jnp.float32)
    w32 = w.astype(jnp.float32)

    # NCHW row-major flatten: channel c owns columns [c*H*W, (c+1)*H*W).
    inv_sig_col = jnp.repeat(inv_sigma, hw).reshape(D, 1)    # (D, 1)
    mu_over_sig = jnp.repeat(mu32 * inv_sigma, hw).reshape(1, D)  # (1, D)

    w_eff = inv_sig_col * w32                                 # (D, K)
    b_eff = b.reshape(1, K).astype(jnp.float32) - mu_over_sig @ w32  # (1, K)

    K_pad = _round_up(K, 128)
    w_pad = (
        jnp.zeros((D, K_pad), jnp.bfloat16)
        .at[:, :K]
        .set(w_eff.astype(jnp.bfloat16))
    )
    b_pad = jnp.zeros((1, K_pad), jnp.float32).at[:, :K].set(b_eff)
    return w_pad, b_pad, K


# ---------------------------------------------------------------------------
# Forward: x (N, C, H, W) -> logits (N, K), using the folded parameters.
# ---------------------------------------------------------------------------
def overfitting_net_forward(x, w_pad, b_pad, num_classes):
    N = x.shape[0]
    D, K_pad = w_pad.shape

    # Lane-dense layout: NCHW flatten is a no-copy row-major view; last dim
    # D = C*H*W is a multiple of 128.
    x_flat = x.reshape(N, D)

    # Pad tiny batches up to one sublane (8 rows).
    N_pad = _round_up(max(N, 8), 8)
    if N_pad != N:
        x_flat = jnp.pad(x_flat, ((0, N_pad - N), (0, 0)))

    # Fixed, VMEM-safe tile: 1024 rows (3 MiB f32, x2 buffers) or the whole
    # (8-aligned) batch if it is smaller.  cdiv handles ragged last blocks.
    tm = min(1024, N_pad)
    grid = (pl.cdiv(N_pad, tm),)

    out_pad = pl.pallas_call(
        _linear_kernel,
        out_shape=jax.ShapeDtypeStruct((N_pad, K_pad), jnp.float32),
        grid=grid,
        in_specs=[
            pl.BlockSpec((tm, D), lambda i: (i, 0)),       # x (flattened)
            pl.BlockSpec((D, K_pad), lambda i: (0, 0)),    # folded weights (bf16)
            pl.BlockSpec((1, K_pad), lambda i: (0, 0)),    # folded bias
        ],
        out_specs=pl.BlockSpec((tm, K_pad), lambda i: (i, 0)),
        compiler_params=pltpu.CompilerParams(
            # "parallel" shards the batch axis across the two TensorCores on
            # v7x when grid >= 2; it is a harmless no-op on v5e/v6e.
            dimension_semantics=("parallel",),
            vmem_limit_bytes=32 * 1024 * 1024,
        ),
    )(x_flat, w_pad, b_pad)

    return out_pad[:N, :num_classes]


if __name__ == "__main__":
    key = jax.random.PRNGKey(0)
    k_x, k_w, k_b = jax.random.split(key, 3)

    # mu/sigma are (3,1,1) in the module => C = 3.
    N, C, H, W = 2, 3, 16, 16
    num_classes = 10
    D = C * H * W

    x = jax.random.uniform(k_x, (N, C, H, W), dtype=jnp.float32)

    # Deterministic normalization constants (ImageNet-style).
    mu = jnp.array([0.485, 0.456, 0.406], dtype=jnp.float32)
    sigma = jnp.array([0.229, 0.224, 0.225], dtype=jnp.float32)

    # Deterministic synthetic inner-net parameters (linear head stand-in).
    w = jax.random.normal(k_w, (D, num_classes), dtype=jnp.float32) / jnp.sqrt(
        jnp.float32(D)
    )
    b = jax.random.normal(k_b, (1, num_classes), dtype=jnp.float32) * 0.01

    # One-time parameter prep (hoisted out of the forward path).
    w_pad, b_pad, K = fold_overfitting_params(mu, sigma, w, b, H, W)
    w_pad, b_pad = jax.block_until_ready((w_pad, b_pad))

    out = overfitting_net_forward(x, w_pad, b_pad, K)
    out = jax.block_until_ready(out)

    # Cross-check against plain JAX (f32 normalize + matmul).  Tolerance is
    # loosened because the kernel deliberately feeds the MXU bf16 operands.
    x_norm_ref = (x - mu.reshape(1, C, 1, 1)) / sigma.reshape(1, C, 1, 1)
    ref = x_norm_ref.reshape(N, -1) @ w + b
    assert out.shape == (N, num_classes)
    assert jnp.allclose(out, ref, atol=5e-2, rtol=5e-2), float(
        jnp.max(jnp.abs(out - ref))
    )

    print("KERNEL_OK")
</pallas_src>

<mosaic_0001>
module attributes {stable_mosaic.version = 11 : i64} {
  func.func @_linear_kernel(%arg0: i32, %arg1: memref<8x768xf32, #tpu.memory_space<vmem>>, %arg2: memref<768x128xbf16, #tpu.memory_space<vmem>>, %arg3: memref<1x128xf32, #tpu.memory_space<vmem>>, %arg4: memref<8x128xf32, #tpu.memory_space<vmem>>) attributes {dimension_semantics = [#tpu.dimension_semantics<parallel>], iteration_bounds = array<i64: 1>, scalar_prefetch = 0 : i64, scratch_operands = 0 : i64, tpu.core_type = #tpu.core_type<tc>, window_params = [{transform_indices = @transform_0, window_bounds = array<i64: 8, 768>}, {pipeline_mode = #tpu.pipeline_mode<synchronous>, transform_indices = @transform_1, window_bounds = array<i64: 768, 128>}, {pipeline_mode = #tpu.pipeline_mode<synchronous>, transform_indices = @transform_2, window_bounds = array<i64: 1, 128>}, {transform_indices = @transform_3, window_bounds = array<i64: 8, 128>}]} {
    %c0 = arith.constant 0 : index
    %c0_0 = arith.constant 0 : index
    %0 = vector.load %arg1[%c0, %c0_0] : memref<8x768xf32, #tpu.memory_space<vmem>>, vector<8x768xf32>
    %1 = arith.truncf %0 : vector<8x768xf32> to vector<8x768xbf16>
    %c0_1 = arith.constant 0 : index
    %c0_2 = arith.constant 0 : index
    %2 = vector.load %arg2[%c0_1, %c0_2] : memref<768x128xbf16, #tpu.memory_space<vmem>>, vector<768x128xbf16>
    %cst = arith.constant dense<0.000000e+00> : vector<8x128xf32>
    %3 = tpu.matmul %1, %2, %cst {dimension_numbers = #tpu.dot_dimension_numbers<[1], [0], [0], [1], [0, 0, 1, 1], [], []>} : vector<8x768xbf16>, vector<768x128xbf16>, vector<8x128xf32> -> vector<8x128xf32>
    %c0_3 = arith.constant 0 : index
    %c0_4 = arith.constant 0 : index
    %4 = vector.load %arg3[%c0_3, %c0_4] : memref<1x128xf32, #tpu.memory_space<vmem>>, vector<1x128xf32>
    %5 = vector.broadcast %4 : vector<1x128xf32> to vector<8x128xf32>
    %6 = arith.addf %3, %5 : vector<8x128xf32>
    %c0_5 = arith.constant 0 : index
    %c0_6 = arith.constant 0 : index
    %7 = vector.load %arg4[%c0_5, %c0_6] : memref<8x128xf32, #tpu.memory_space<vmem>>, vector<8x128xf32>
    tpu.vector_store %arg4[%c0_5, %c0_6], %6 {strides = array<i32>} : memref<8x128xf32, #tpu.memory_space<vmem>>, vector<8x128xf32>,
    return
  }
  func.func @transform_0(%arg0: i32) -> (i32, i32) {
    %c0_i32 = arith.constant 0 : i32
    %c0_i32_0 = arith.constant 0 : i32
    return %arg0, %c0_i32 : i32, i32
  }
  func.func @transform_1(%arg0: i32) -> (i32, i32) {
    %c0_i32 = arith.constant 0 : i32
    %c0_i32_0 = arith.constant 0 : i32
    %c0_i32_1 = arith.constant 0 : i32
    return %c0_i32, %c0_i32_0 : i32, i32
  }
  func.func @transform_2(%arg0: i32) -> (i32, i32) {
    %c0_i32 = arith.constant 0 : i32
    %c0_i32_0 = arith.constant 0 : i32
    %c0_i32_1 = arith.constant 0 : i32
    return %c0_i32, %c0_i32_0 : i32, i32
  }
  func.func @transform_3(%arg0: i32) -> (i32, i32) {
    %c0_i32 = arith.constant 0 : i32
    %c0_i32_0 = arith.constant 0 : i32
    return %arg0, %c0_i32 : i32, i32
  }
}

</mosaic_0001>

<bundles_post_ra>
// kernel: tpu_custom_call.1
= control target key start
LH: loop header
LB: loop body
LE: loop exit
PB: predicated region body
PF: predicated region fallthrough
CT: control target
= control target key end

     0   :  { %8 = vsyncpa [#allocation3], 0  ;;  %s853_s0 = inlined_call_operand.hbm [shape: f32[8,768], index: 0, kind: input, shape index: {}]   ;;  %s854_s1 = inlined_call_operand.hbm [shape: bf16[768,128], index: 1, kind: input, shape index: {}]   ;;  %s855_s2 = inlined_call_operand.vmem [shape: f32[1,128], index: 2, kind: input, shape index: {}]   ;;  %s856_s3 = inlined_call_operand.hbm [shape: f32[8,128], index: 3, kind: output, shape index: {}]  }
   0x1   :  { %9 = vsyncpa [#allocation6], 0 }
   0x2   :  { %10 = vsyncpa [#allocation4], 0  ;;  %s816_s12 = smov [#allocation2]   ;;  %s817_s14 = smov [#allocation5]  }
   0x3   :  { %s17_s13 = sshll.u32 %s816_s12, 4  ;;  %s26_s15 = sshll.u32 %s817_s14, 4  ;;  %s18_s13 = int_to_ptr.vmem [resolvable:$true] %s17_s13  ;;  %s27_s15 = int_to_ptr.vmem [resolvable:$true] %s26_s15 }
   0x4   :  { %s758_s16 = scalar_lea.vmem %s18_s13, 768  ;;  %p763_p1 = scmp.lt.s32.totalorder %s18_s13, %s18_s13 }
   0x5   :  { %p759_p0 = scmp.ne.s32.totalorder %s18_s13, %s758_s16  ;;  %p764_p2 = scmp.lt.s32.totalorder %s758_s16, %s758_s16 }
   0x7   :  { %p765_p3 = por %p764_p2, %p763_p1 }
   0x9   :  { %p766_p4 = pnand %p765_p3, %p759_p0 }
   0xb   :  { %769 = shalt.err (!%p766_p4)
}
   0xc   :  { %20 = dma.hbm_to_vmem [thread:$0]  %s853_s0, 768, %s18_s13, [#allocation3]  }
   0xd   :  { %s778_s19 = scalar_lea.vmem %s27_s15, 6144  ;;  %p783_p6 = scmp.lt.s32.totalorder %s27_s15, %s27_s15 }
   0xe   :  { %p779_p5 = scmp.ne.s32.totalorder %s27_s15, %s778_s19  ;;  %p784_p7 = scmp.lt.s32.totalorder %s778_s19, %s778_s19 }
  0x10   :  { %p785_p8 = por %p784_p7, %p783_p6 }
  0x12   :  { %p786_p9 = pnand %p785_p8, %p779_p5 }
  0x14   :  { %789 = shalt.err (!%p786_p9)
}
  0x15   :  { %s818_s20 = smov 64   ;;  %s819_s21 = smov 4  }
  0x16   :  { %32 = dma.hbm_to_vmem [thread:$0]  %s854_s1, 6144, %s27_s15, [#allocation6], %s818_s20, %s818_s20, %s819_s21  }
  0x17   :  { %810 = dma.done.wait [#allocation3], 768  }
  0x18   :  { %811 = vsyncadd [#allocation3], 4294966528 }
  0x19   :  { %812 = dma.done.wait [#allocation6], 6144  }
  0x1a   :  { %813 = vsyncadd [#allocation6], 4294961152  ;;  %v702_v0 = vld [vmem:[#allocation5 + $0x78] sm:$0xff]   ;;  %v706_v4 = vld [vmem:[#allocation5 + $0x70] sm:$0xff]   ;;  %s820_s24 = smov [#allocation7]  }
  0x1b   :  { %v703_v1 = vld [vmem:[#allocation5 + $0x38] sm:$0xff]   ;;  %631 = vmatprep.subr.bf16.mxu0 %v702_v0  ;;  %v707_v5 = vld [vmem:[#allocation5 + $0x30] sm:$0xff]   ;;  %v710_v8 = vld [vmem:[#allocation5 + $0x68] sm:$0xff]   ;;  %s572_s25 = sshll.u32 %s820_s24, 4  ;;  %s573_s25 = int_to_ptr.vmem [resolvable:$true] %s572_s25 }
  0x1c   :  { %v704_v2 = vld [vmem:[#allocation5 + $0xf8] sm:$0xff]   ;;  %632 = vmatpush3.bf16.msra.mxu0 %v703_v1  ;;  %v708_v6 = vld [vmem:[#allocation5 + $0xf0] sm:$0xff]   ;;  %v711_v9 = vld [vmem:[#allocation5 + $0x28] sm:$0xff]   ;;  %s790_s26 = scalar_lea.vmem %s573_s25, 128  ;;  %p795_p11 = scmp.lt.s32.totalorder %s573_s25, %s573_s25 }
  0x1d   :  { %v705_v3 = vld [vmem:[#allocation5 + $0xb8] sm:$0xff]   ;;  %653 = vmatprep.subr.bf16.mxu1 %v704_v2  ;;  %633 = vmatprep.subr.bf16.mxu0 %v706_v4  ;;  %v709_v7 = vld [vmem:[#allocation5 + $0xb0] sm:$0xff]   ;;  %v712_v10 = vld [vmem:[#allocation5 + $0xe8] sm:$0xff]   ;;  %p791_p10 = scmp.ne.s32.totalorder %s573_s25, %s790_s26  ;;  %p796_p12 = scmp.lt.s32.totalorder %s790_s26, %s790_s26 }
  0x1e   :  { %654 = vmatpush3.bf16.msra.mxu1 %v705_v3  ;;  %v713_v11 = vld [vmem:[#allocation5 + $0xa8] sm:$0xff]   ;;  %v714_v12 = vld [vmem:[#allocation5 + $0x60] sm:$0xff]   ;;  %v718_v16 = vld [vmem:[#allocation5 + $0x58] sm:$0xff]  }
  0x1f   :  { %655 = vmatprep.subr.bf16.mxu1 %v708_v6  ;;  %v715_v13 = vld [vmem:[#allocation5 + $0x20] sm:$0xff]   ;;  %v719_v17 = vld [vmem:[#allocation5 + $0x18] sm:$0xff]   ;;  %v722_v20 = vld [vmem:[#allocation5 + $0x50] sm:$0xff]   ;;  %p797_p13 = por %p796_p12, %p795_p11 }
  0x20   :  { %634 = vmatpush3.bf16.msra.mxu0 %v707_v5  ;;  %v716_v14 = vld [vmem:[#allocation5 + $0xe0] sm:$0xff]   ;;  %v720_v18 = vld [vmem:[#allocation5 + $0xd8] sm:$0xff]   ;;  %v723_v21 = vld [vmem:[#allocation5 + $0x10] sm:$0xff]  }
  0x21   :  { %635 = vmatprep.subr.bf16.mxu0 %v710_v8  ;;  %v717_v15 = vld [vmem:[#allocation5 + $0xa0] sm:$0xff]   ;;  %v721_v19 = vld [vmem:[#allocation5 + $0x98] sm:$0xff]   ;;  %v724_v22 = vld [vmem:[#allocation5 + $0xd0] sm:$0xff]   ;;  %p798_p0 = pnand %p797_p13, %p791_p10 }
  0x22   :  { %656 = vmatpush3.bf16.msra.mxu1 %v709_v7  ;;  %v725_v23 = vld [vmem:[#allocation5 + $0x90] sm:$0xff]   ;;  %v726_v24 = vld [vmem:[#allocation5 + $0x48] sm:$0xff]   ;;  %v730_v28 = vld [vmem:[#allocation5 + $0x40] sm:$0xff]  }
  0x23   :  { %657 = vmatprep.subr.bf16.mxu1 %v712_v10  ;;  %v727_v25 = vld [vmem:[#allocation5 + $0x8] sm:$0xff]   ;;  %v731_v29 = vld [vmem:[#allocation5] sm:$0xff]   ;;  %v43_v31 = vld [vmem:[#allocation2 + $0x8] sm:$0xff] }
  0x24   :  { %636 = vmatpush3.bf16.msra.mxu0 %v711_v9  ;;  %v728_v26 = vld [vmem:[#allocation5 + $0xc8] sm:$0xff]   ;;  %v732_v30 = vld [vmem:[#allocation5 + $0xc0] sm:$0xff]   ;;  %v49_v32 = vpack.c.bf16 %v43_v31, %v43_v31  ;;  %v42_v34 = vld [vmem:[#allocation2] sm:$0xff] }
  0x25   :  { %637 = vmatprep.subr.bf16.mxu0 %v714_v12  ;;  %v729_v27 = vld [vmem:[#allocation5 + $0x88] sm:$0xff]   ;;  %v733_v33 = vld [vmem:[#allocation5 + $0x80] sm:$0xff]   ;;  %v48_v35 = vpack.c.bf16 %v42_v34, %v42_v34  ;;  %v734_v36 = vld [vmem:[#allocation5 + $0x178] sm:$0xff]  }
  0x26   :  { %658 = vmatpush3.bf16.msra.mxu1 %v713_v11  ;;  %v45_v37 = vld [vmem:[#allocation2 + $0x18] sm:$0xff]  ;;  %477 = vmatprep.mubr.bf16.mxu0 %v49_v32  ;;  %v735_v39 = vld [vmem:[#allocation5 + $0x138] sm:$0xff]   ;;  %v44_v40 = vld [vmem:[#allocation2 + $0x10] sm:$0xff] }
  0x27   :  { %659 = vmatprep.subr.bf16.mxu1 %v716_v14  ;;  %v51_v38 = vpack.c.bf16 %v45_v37, %v45_v37  ;;  %v50_v41 = vpack.c.bf16 %v44_v40, %v44_v40  ;;  %v736_v42 = vld [vmem:[#allocation5 + $0x170] sm:$0xff]   ;;  %v738_v44 = vld [vmem:[#allocation5 + $0x168] sm:$0xff]   ;;  %v740_v46 = vld [vmem:[#allocation5 + $0x160] sm:$0xff]  }
  0x28   :  { %638 = vmatpush3.bf16.msra.mxu0 %v715_v13  ;;  %v737_v43 = vld [vmem:[#allocation5 + $0x130] sm:$0xff]   ;;  %v739_v45 = vld [vmem:[#allocation5 + $0x128] sm:$0xff]   ;;  %v741_v47 = vld [vmem:[#allocation5 + $0x120] sm:$0xff]  }
  0x29   :  { %639 = vmatprep.subr.bf16.mxu0 %v718_v16  ;;  %517 = vmatprep.mubr.bf16.mxu1 %v51_v38  ;;  %v742_v48 = vld [vmem:[#allocation5 + $0x158] sm:$0xff]   ;;  %v744_v50 = vld [vmem:[#allocation5 + $0x150] sm:$0xff]   ;;  %v746_v54 = vld [vmem:[#allocation5 + $0x148] sm:$0xff]  }
  0x2a   :  { %660 = vmatpush3.bf16.msra.mxu1 %v717_v15  ;;  %v743_v49 = vld [vmem:[#allocation5 + $0x118] sm:$0xff]   ;;  %v745_v53 = vld [vmem:[#allocation5 + $0x110] sm:$0xff]   ;;  %v747_v55 = vld [vmem:[#allocation5 + $0x108] sm:$0xff]  }
  0x2b   :  { %661 = vmatprep.subr.bf16.mxu1 %v720_v18  ;;  %v47_v51 = vld [vmem:[#allocation2 + $0x28] sm:$0xff]  ;;  %v748_v56 = vld [vmem:[#allocation5 + $0x140] sm:$0xff]   ;;  %v46_v58 = vld [vmem:[#allocation2 + $0x20] sm:$0xff] }
  0x2c   :  { %640 = vmatpush3.bf16.msra.mxu0 %v719_v17  ;;  %v53_v52 = vpack.c.bf16 %v47_v51, %v47_v51  ;;  %v749_v57 = vld [vmem:[#allocation5 + $0x100] sm:$0xff]   ;;  %v52_v59 = vpack.c.bf16 %v46_v58, %v46_v58  ;;  %v582_v5 = vld [vmem:[%s855_s2] ss:$0 sm:$0xff] }
  0x2d   :  { %641 = vmatprep.subr.bf16.mxu0 %v722_v20 }
  0x2e   :  { %662 = vmatpush3.bf16.msra.mxu1 %v721_v19 }
  0x2f   :  { %663 = vmatprep.subr.bf16.mxu1 %v724_v22 }
  0x30   :  { %642 = vmatpush3.bf16.msra.mxu0 %v723_v21 }
  0x31   :  { %643 = vmatprep.subr.bf16.mxu0 %v726_v24 }
  0x32   :  { %664 = vmatpush3.bf16.msra.mxu1 %v725_v23 }
  0x33   :  { %665 = vmatprep.subr.bf16.mxu1 %v728_v26 }
  0x34   :  { %644 = vmatpush3.bf16.msra.mxu0 %v727_v25 }
  0x35   :  { %645 = vmatprep.subr.bf16.mxu0 %v730_v28 }
  0x36   :  { %666 = vmatpush3.bf16.msra.mxu1 %v729_v27 }
  0x37   :  { %667 = vmatprep.subr.bf16.mxu1 %v732_v30 }
  0x38   :  { %646 = vmatpush3.bf16.msra.mxu0 %v731_v29 }
  0x39   :  { %675 = vmatprep.subr.bf16.mxu0 %v734_v36 }
  0x3a   :  { %668 = vmatpush3.bf16.msra.mxu1 %v733_v33 }
  0x3b   :  { %478 = vmatmul.mubr.bf16.vlgmr.msra.gmra.mxu0 %v48_v35 }
  0x3c   :  { %676 = vmatpush3.bf16.msra.mxu0 %v735_v39  ;;  %557 = vmatprep.mubr.bf16.mxu0 %v53_v52 }
  0x3d   :  { %518 = vmatmul.mubr.bf16.vlgmr.msra.gmra.mxu1 %v50_v41  ;;  %677 = vmatprep.subr.bf16.mxu0 %v736_v42 }
  0x40   :  { %678 = vmatpush3.bf16.msra.mxu0 %v737_v43 }
  0x41   :  { %679 = vmatprep.subr.bf16.mxu0 %v738_v44 }
  0x44   :  { %680 = vmatpush3.bf16.msra.mxu0 %v739_v45 }
  0x45   :  { %681 = vmatprep.subr.bf16.mxu0 %v740_v46 }
  0x48   :  { %682 = vmatpush3.bf16.msra.mxu0 %v741_v47 }
  0x49   :  { %683 = vmatprep.subr.bf16.mxu0 %v742_v48 }
  0x4c   :  { %684 = vmatpush3.bf16.msra.mxu0 %v743_v49 }
  0x4d   :  { %685 = vmatprep.subr.bf16.mxu0 %v744_v50 }
  0x50   :  { %686 = vmatpush3.bf16.msra.mxu0 %v745_v53 }
  0x51   :  { %687 = vmatprep.subr.bf16.mxu0 %v746_v54 }
  0x54   :  { %688 = vmatpush3.bf16.msra.mxu0 %v747_v55 }
  0x55   :  { %689 = vmatprep.subr.bf16.mxu0 %v748_v56 }
  0x58   :  { %690 = vmatpush3.bf16.msra.mxu0 %v749_v57 }
  0x5b   :  { %558 = vmatmul.mubr.bf16.vlgmr.msra.gmra.mxu0 %v52_v59 }
  0xfb   :  { %v647_v60 = vpop.f32.mrf.mxu0 }
  0xfd   :  { %v648_v61 = vpop.f32.mrf.mxu0  ;;  %v669_v62 = vpop.f32.mrf.mxu1 }
  0xfe   :  { %v649_v4 = vadd.f32 %v648_v61, %v647_v60 }
  0xff   :  { %v650_v63 = vpop.f32.mrf.mxu0  ;;  %v670_v0 = vpop.f32.mrf.mxu1 }
 0x100   :  { %v480_v6 = vadd.f32 %v649_v4, %v582_v5  ;;  %v671_v7 = vadd.f32 %v670_v0, %v669_v62 }
 0x101   :  { %v651_v1 = vpop.f32.mrf.mxu0  ;;  %v672_v2 = vpop.f32.mrf.mxu1 }
 0x102   :  { %v520_v10 = vadd.f32 %v671_v7, %v480_v6 }
 0x103   :  { %v673_v3 = vpop.f32.mrf.mxu1 }
 0x11b   :  { %v691_v8 = vpop.f32.mrf.mxu0 }
 0x11d   :  { %v692_v9 = vpop.f32.mrf.mxu0 }
 0x11e   :  { %v693_v11 = vadd.f32 %v692_v9, %v691_v8 }
 0x11f   :  { %v694_v12 = vpop.f32.mrf.mxu0 }
 0x120   :  { %v560_v13 = vadd.f32 %v693_v11, %v520_v10 }
 0x121   :  { %v695_v14 = vpop.f32.mrf.mxu0 }
 0x122   :  { %565 = vst [vmem:[#allocation7] sm:$0xff] %v560_v13 }
 0x123   :  { %801 = shalt.err (!%p798_p0)
}
 0x124   :  { %575 = dma.vmem_to_hbm [thread:$0]  %s573_s25, 128, %s856_s3, [#allocation4]  }
 0x125   :  { %814 = dma.done.wait [#allocation4], 128  }
 0x126   :  { %815 = vsyncadd [#allocation4], 4294967168 }
 0x127   :  { %579 = vsyncpa [#allocation3], 1 }
 0x128   :  { %580 = vsyncpa [#allocation6], 1 }
 0x129   :  { %581 = vsyncpa [#allocation4], 1 }

</bundles_post_ra>
